<compile_context>
chip_gen: v7x
topology: tpu7x:2x2x1
jax: 0.10.0
libtpu: 0.0.40
codegen_flags: <defaults>
</compile_context>

<pallas_src>
import math

import jax
import jax.numpy as jnp
from jax.experimental import pallas as pl
from jax.experimental.pallas import tpu as pltpu


_PRED_PAD = -1e9  # tanh-sigmoid saturates to exactly 0 -> pads contribute nothing


def _round_up(x, m):
    return ((x + m - 1) // m) * m


def _make_fused_kernel(num_levels):
    """Kernel args: gt_ref, pred_ref[0..L-1], st_ref, itp_ref[0..L-1], sp_ref[0..L-1]."""

    def kernel(gt_ref, *rest):
        pred_refs = rest[:num_levels]
        out_refs = rest[num_levels:]
        st_ref = out_refs[0]
        itp_refs = out_refs[1:1 + num_levels]
        sp_refs = out_refs[1 + num_levels:]

        li = pl.program_id(1)  # CHW (reduction) axis, innermost

        @pl.when(li == 0)
        def _init():
            st_ref[...] = jnp.zeros_like(st_ref)
            for r in itp_refs:
                r[...] = jnp.zeros_like(r)
            for r in sp_refs:
                r[...] = jnp.zeros_like(r)

        t = gt_ref[...].astype(jnp.float32)
        st_ref[...] += jnp.sum(t, axis=-1, keepdims=True)

        for l in range(num_levels):
            x = pred_refs[l][...].astype(jnp.float32)
            # Divide-free sigmoid: one EUP tanh push, no reciprocal/divide.
            p = 0.5 * jnp.tanh(0.5 * x) + 0.5
            itp_refs[l][...] += jnp.sum(t * p, axis=-1, keepdims=True)
            sp_refs[l][...] += jnp.sum(p, axis=-1, keepdims=True)

    return kernel


def _fused_iou_sums(scaled_preds, gt, *, stream_dtype=None):
    """One pallas_call for all levels.

    Returns (st, itp_list, sp_list): st is (B,) f32 = sum(gt) per sample;
    itp_list[l]/sp_list[l] are (B,) f32 = sum(gt*sigmoid(p_l)) / sum(sigmoid(p_l)).
    """
    num_levels = len(scaled_preds)
    assert num_levels >= 1
    for p in scaled_preds:
        assert p.shape == gt.shape, (p.shape, gt.shape)

    b = gt.shape[0]
    chw = math.prod(gt.shape[1:])

    dtype = jnp.float32 if stream_dtype is None else stream_dtype
    itemsize = jnp.dtype(dtype).itemsize
    sub = 16 if itemsize == 2 else 8  # min sublane tile for the stream dtype

    # -- sublane fold: (B, CHW) -> (B*k, CHW/k) so rows are a multiple of the
    #    sublane tile and every vreg is fully populated with real data.
    k = sub // math.gcd(b, sub)
    # Prefer >= 2 batch tiles (keeps v7x's second TensorCore busy) as long as
    # the folded row length stays lane-dense.
    while (b * k) < 2 * sub and chw // (2 * k) >= 2 * 128:
        k *= 2
    rows = b * k          # always a multiple of `sub`
    bt = sub              # exact tiling, no row padding needed

    chw_fold = _round_up(chw, k)
    raw_cols = chw_fold // k
    cols128 = _round_up(raw_cols, 128)  # lane-dense

    # -- per-input block budget sized per generation.
    num_streams = num_levels + 1
    try:
        vmem_cap = int(getattr(pltpu.get_tpu_info(), "vmem_capacity_bytes", 64 << 20))
    except Exception:
        vmem_cap = 64 << 20  # assume the smallest (v7x per-core VMEM)
    # Total double-buffered input VMEM target; v7x (64 MiB) stays <= ~40 MiB,
    # v5e/v6e (128 MiB physical) go bigger with the scoped limit raised.
    target_total = (64 << 20) if vmem_cap > (64 << 20) else (40 << 20)
    per_input = max(512 << 10, min(target_total // (2 * num_streams), 8 << 20))
    vmem_limit = target_total + (8 << 20)

    lt_max = max(128, (per_input // (itemsize * bt)) // 128 * 128)
    if cols128 <= lt_max:
        lt, cols_pad = cols128, cols128          # single reduction step
    else:
        lt = lt_max
        cols_pad = _round_up(cols128, lt)
    nb = rows // bt
    nl = cols_pad // lt

    def prep(x, pad_val):
        x2 = x.reshape(b, chw)
        if chw_fold != chw:
            x2 = jnp.pad(x2, ((0, 0), (0, chw_fold - chw)), constant_values=pad_val)
        x2 = x2.reshape(rows, raw_cols)
        if cols_pad != raw_cols:
            x2 = jnp.pad(x2, ((0, 0), (0, cols_pad - raw_cols)),
                         constant_values=pad_val)
        return x2.astype(dtype)

    # Padded columns: gt pad = 0 and sigmoid(-1e9) = 0 exactly -> contribute 0
    # to every streamed sum; the complement IoU uses the *true* N in the wrapper.
    gt2 = prep(gt, 0.0)
    preds2 = [prep(p, _PRED_PAD) for p in scaled_preds]

    in_block = pl.BlockSpec((bt, lt), lambda bi, li: (bi, li))
    out_block = pl.BlockSpec((bt, 1), lambda bi, li: (bi, 0))  # resident accumulator
    n_out = 1 + 2 * num_levels

    elems = rows * cols_pad
    cost = pl.CostEstimate(
        flops=(6 * num_levels + 1) * elems,
        transcendentals=num_levels * elems,
        bytes_accessed=num_streams * elems * itemsize + n_out * rows * 4,
    )

    outs = pl.pallas_call(
        _make_fused_kernel(num_levels),
        out_shape=tuple(
            jax.ShapeDtypeStruct((rows, 1), jnp.float32) for _ in range(n_out)
        ),
        grid_spec=pltpu.PrefetchScalarGridSpec(
            num_scalar_prefetch=0,
            grid=(nb, nl),  # reduction (CHW) axis last
            in_specs=[in_block] * num_streams,
            out_specs=tuple(out_block for _ in range(n_out)),
        ),
        compiler_params=pltpu.CompilerParams(
            dimension_semantics=("parallel", "arbitrary"),
            vmem_limit_bytes=vmem_limit,
        ),
        cost_estimate=cost,
    )(gt2, *preds2)

    def fold_back(o):  # (rows, 1) -> (B,) by summing the k folded sub-rows
        return o[:, 0].reshape(b, k).sum(axis=1)

    st = fold_back(outs[0])
    itp = [fold_back(o) for o in outs[1:1 + num_levels]]
    sp = [fold_back(o) for o in outs[1 + num_levels:]]
    return st, itp, sp


def scale_iou(scaled_preds, gt, eps=1e-5, stream_dtype=None):
    """Pallas equivalent of Scale_IoU.forward(scaled_preds, gt). Scalar out.

    Pass stream_dtype=jnp.bfloat16 to halve HBM traffic (slightly relaxed
    numerics); default f32 matches the original module exactly.
    """
    b = gt.shape[0]
    n = float(math.prod(gt.shape[1:]))  # true elements per sample

    st, itp, sp = _fused_iou_sums(scaled_preds, gt, stream_dtype=stream_dtype)

    total = jnp.float32(0.0)
    for l in range(len(scaled_preds)):
        iand = itp[l]
        s = st + sp[l]                      # sum(gt) + sum(sigmoid(p))
        iou1 = iand / (s - iand + eps)      # IoU(sigmoid(p), gt)
        # IoU(1 - sigmoid(p), 1 - gt): iand2 = n - s + iand, ior2 = n - iand
        iou2 = (n - s + iand) / (n - iand + eps)
        total = total + jnp.sum((1.0 - iou1) + (1.0 - iou2)) / b
    return total


# ---------------------------------------------------------------------------
# Pure-JAX reference matching the PyTorch loop semantics.
# ---------------------------------------------------------------------------
def _iou_loss_ref(pred, target):
    b = pred.shape[0]
    axes = tuple(range(1, pred.ndim))
    iand = jnp.sum(target * pred, axis=axes)
    ior = jnp.sum(target, axis=axes) + jnp.sum(pred, axis=axes) - iand
    iou = iand / (ior + 1e-5)
    return jnp.sum(1.0 - iou) / b


def scale_iou_ref(scaled_preds, gt):
    loss = jnp.float32(0.0)
    for pred_lvl in scaled_preds:
        sg = jax.nn.sigmoid(pred_lvl)
        loss = loss + _iou_loss_ref(sg, gt) + _iou_loss_ref(1.0 - sg, 1.0 - gt)
    return loss


if __name__ == "__main__":
    key = jax.random.PRNGKey(0)
    kp, kg = jax.random.split(key)

    B, C, H, W = 2, 4, 16, 16
    num_levels = 3
    level_keys = jax.random.split(kp, num_levels)
    scaled_preds = [
        jax.random.normal(k, (B, C, H, W), dtype=jnp.float32) for k in level_keys
    ]
    gt = (jax.random.uniform(kg, (B, C, H, W)) > 0.5).astype(jnp.float32)

    out = scale_iou(scaled_preds, gt)
    jax.block_until_ready(out)

    ref = scale_iou_ref(scaled_preds, gt)
    assert jnp.allclose(out, ref, rtol=1e-4, atol=1e-4), (out, ref)

    print("KERNEL_OK")
</pallas_src>

<mosaic_0001>
module attributes {stable_mosaic.version = 11 : i64} {
  func.func @kernel(%arg0: i32, %arg1: i32, %arg2: memref<8x256xf32, #tpu.memory_space<vmem>>, %arg3: memref<8x256xf32, #tpu.memory_space<vmem>>, %arg4: memref<8x256xf32, #tpu.memory_space<vmem>>, %arg5: memref<8x256xf32, #tpu.memory_space<vmem>>, %arg6: memref<8x1xf32, #tpu.memory_space<vmem>>, %arg7: memref<8x1xf32, #tpu.memory_space<vmem>>, %arg8: memref<8x1xf32, #tpu.memory_space<vmem>>, %arg9: memref<8x1xf32, #tpu.memory_space<vmem>>, %arg10: memref<8x1xf32, #tpu.memory_space<vmem>>, %arg11: memref<8x1xf32, #tpu.memory_space<vmem>>, %arg12: memref<8x1xf32, #tpu.memory_space<vmem>>) attributes {dimension_semantics = [#tpu.dimension_semantics<parallel>, #tpu.dimension_semantics<arbitrary>], iteration_bounds = array<i64: 1, 1>, scalar_prefetch = 0 : i64, scratch_operands = 0 : i64, tpu.core_type = #tpu.core_type<tc>, window_params = [{transform_indices = @transform_0, window_bounds = array<i64: 8, 256>}, {transform_indices = @transform_1, window_bounds = array<i64: 8, 256>}, {transform_indices = @transform_2, window_bounds = array<i64: 8, 256>}, {transform_indices = @transform_3, window_bounds = array<i64: 8, 256>}, {transform_indices = @transform_4, window_bounds = array<i64: 8, 1>}, {transform_indices = @transform_5, window_bounds = array<i64: 8, 1>}, {transform_indices = @transform_6, window_bounds = array<i64: 8, 1>}, {transform_indices = @transform_7, window_bounds = array<i64: 8, 1>}, {transform_indices = @transform_8, window_bounds = array<i64: 8, 1>}, {transform_indices = @transform_9, window_bounds = array<i64: 8, 1>}, {transform_indices = @transform_10, window_bounds = array<i64: 8, 1>}]} {
    %c0_i32 = arith.constant 0 : i32
    %0 = arith.cmpi eq, %arg1, %c0_i32 : i32
    %1 = arith.extui %0 : i1 to i32
    %c0_i32_0 = arith.constant 0 : i32
    %2 = arith.cmpi ne, %1, %c0_i32_0 : i32
    scf.if %2 {
      %cst_51 = arith.constant 0.000000e+00 : f32
      %66 = vector.broadcast %cst_51 : f32 to vector<8x1xf32>
      %c0_52 = arith.constant 0 : index
      %c0_53 = arith.constant 0 : index
      %67 = vector.load %arg6[%c0_52, %c0_53] : memref<8x1xf32, #tpu.memory_space<vmem>>, vector<8x1xf32>
      tpu.vector_store %arg6[%c0_52, %c0_53], %66 {strides = array<i32>} : memref<8x1xf32, #tpu.memory_space<vmem>>, vector<8x1xf32>,
      %cst_54 = arith.constant 0.000000e+00 : f32
      %68 = vector.broadcast %cst_54 : f32 to vector<8x1xf32>
      %c0_55 = arith.constant 0 : index
      %c0_56 = arith.constant 0 : index
      %69 = vector.load %arg7[%c0_55, %c0_56] : memref<8x1xf32, #tpu.memory_space<vmem>>, vector<8x1xf32>
      tpu.vector_store %arg7[%c0_55, %c0_56], %68 {strides = array<i32>} : memref<8x1xf32, #tpu.memory_space<vmem>>, vector<8x1xf32>,
      %cst_57 = arith.constant 0.000000e+00 : f32
      %70 = vector.broadcast %cst_57 : f32 to vector<8x1xf32>
      %c0_58 = arith.constant 0 : index
      %c0_59 = arith.constant 0 : index
      %71 = vector.load %arg8[%c0_58, %c0_59] : memref<8x1xf32, #tpu.memory_space<vmem>>, vector<8x1xf32>
      tpu.vector_store %arg8[%c0_58, %c0_59], %70 {strides = array<i32>} : memref<8x1xf32, #tpu.memory_space<vmem>>, vector<8x1xf32>,
      %cst_60 = arith.constant 0.000000e+00 : f32
      %72 = vector.broadcast %cst_60 : f32 to vector<8x1xf32>
      %c0_61 = arith.constant 0 : index
      %c0_62 = arith.constant 0 : index
      %73 = vector.load %arg9[%c0_61, %c0_62] : memref<8x1xf32, #tpu.memory_space<vmem>>, vector<8x1xf32>
      tpu.vector_store %arg9[%c0_61, %c0_62], %72 {strides = array<i32>} : memref<8x1xf32, #tpu.memory_space<vmem>>, vector<8x1xf32>,
      %cst_63 = arith.constant 0.000000e+00 : f32
      %74 = vector.broadcast %cst_63 : f32 to vector<8x1xf32>
      %c0_64 = arith.constant 0 : index
      %c0_65 = arith.constant 0 : index
      %75 = vector.load %arg10[%c0_64, %c0_65] : memref<8x1xf32, #tpu.memory_space<vmem>>, vector<8x1xf32>
      tpu.vector_store %arg10[%c0_64, %c0_65], %74 {strides = array<i32>} : memref<8x1xf32, #tpu.memory_space<vmem>>, vector<8x1xf32>,
      %cst_66 = arith.constant 0.000000e+00 : f32
      %76 = vector.broadcast %cst_66 : f32 to vector<8x1xf32>
      %c0_67 = arith.constant 0 : index
      %c0_68 = arith.constant 0 : index
      %77 = vector.load %arg11[%c0_67, %c0_68] : memref<8x1xf32, #tpu.memory_space<vmem>>, vector<8x1xf32>
      tpu.vector_store %arg11[%c0_67, %c0_68], %76 {strides = array<i32>} : memref<8x1xf32, #tpu.memory_space<vmem>>, vector<8x1xf32>,
      %cst_69 = arith.constant 0.000000e+00 : f32
      %78 = vector.broadcast %cst_69 : f32 to vector<8x1xf32>
      %c0_70 = arith.constant 0 : index
      %c0_71 = arith.constant 0 : index
      %79 = vector.load %arg12[%c0_70, %c0_71] : memref<8x1xf32, #tpu.memory_space<vmem>>, vector<8x1xf32>
      tpu.vector_store %arg12[%c0_70, %c0_71], %78 {strides = array<i32>} : memref<8x1xf32, #tpu.memory_space<vmem>>, vector<8x1xf32>,
    } else {
    }
    %c0 = arith.constant 0 : index
    %c0_1 = arith.constant 0 : index
    %3 = vector.load %arg2[%c0, %c0_1] : memref<8x256xf32, #tpu.memory_space<vmem>>, vector<8x256xf32>
    %c0_2 = arith.constant 0 : index
    %c0_3 = arith.constant 0 : index
    %4 = vector.load %arg6[%c0_2, %c0_3] : memref<8x1xf32, #tpu.memory_space<vmem>>, vector<8x1xf32>
    %cst = arith.constant dense<0.000000e+00> : vector<8xf32>
    %5 = vector.multi_reduction <add>, %3, %cst [1] : vector<8x256xf32> to vector<8xf32>
    %6 = vector.shape_cast %5 : vector<8xf32> to vector<8x1xf32>
    %7 = arith.addf %4, %6 : vector<8x1xf32>
    %c0_4 = arith.constant 0 : index
    %c0_5 = arith.constant 0 : index
    %8 = vector.load %arg6[%c0_4, %c0_5] : memref<8x1xf32, #tpu.memory_space<vmem>>, vector<8x1xf32>
    tpu.vector_store %arg6[%c0_4, %c0_5], %7 {strides = array<i32>} : memref<8x1xf32, #tpu.memory_space<vmem>>, vector<8x1xf32>,
    %c0_6 = arith.constant 0 : index
    %c0_7 = arith.constant 0 : index
    %9 = vector.load %arg3[%c0_6, %c0_7] : memref<8x256xf32, #tpu.memory_space<vmem>>, vector<8x256xf32>
    %cst_8 = arith.constant 5.000000e-01 : f32
    %10 = vector.broadcast %cst_8 : f32 to vector<8x256xf32>
    %11 = arith.mulf %10, %9 : vector<8x256xf32>
    %12 = math.tanh %11 : vector<8x256xf32>
    %cst_9 = arith.constant 5.000000e-01 : f32
    %13 = vector.broadcast %cst_9 : f32 to vector<8x256xf32>
    %14 = arith.mulf %13, %12 : vector<8x256xf32>
    %cst_10 = arith.constant 5.000000e-01 : f32
    %15 = vector.broadcast %cst_10 : f32 to vector<8x256xf32>
    %16 = arith.addf %14, %15 : vector<8x256xf32>
    %c0_11 = arith.constant 0 : index
    %c0_12 = arith.constant 0 : index
    %17 = vector.load %arg7[%c0_11, %c0_12] : memref<8x1xf32, #tpu.memory_space<vmem>>, vector<8x1xf32>
    %18 = arith.mulf %3, %16 : vector<8x256xf32>
    %cst_13 = arith.constant dense<0.000000e+00> : vector<8xf32>
    %19 = vector.multi_reduction <add>, %18, %cst_13 [1] : vector<8x256xf32> to vector<8xf32>
    %20 = vector.shape_cast %19 : vector<8xf32> to vector<8x1xf32>
    %21 = arith.addf %17, %20 : vector<8x1xf32>
    %c0_14 = arith.constant 0 : index
    %c0_15 = arith.constant 0 : index
    %22 = vector.load %arg7[%c0_14, %c0_15] : memref<8x1xf32, #tpu.memory_space<vmem>>, vector<8x1xf32>
    tpu.vector_store %arg7[%c0_14, %c0_15], %21 {strides = array<i32>} : memref<8x1xf32, #tpu.memory_space<vmem>>, vector<8x1xf32>,
    %c0_16 = arith.constant 0 : index
    %c0_17 = arith.constant 0 : index
    %23 = vector.load %arg10[%c0_16, %c0_17] : memref<8x1xf32, #tpu.memory_space<vmem>>, vector<8x1xf32>
    %cst_18 = arith.constant dense<0.000000e+00> : vector<8xf32>
    %24 = vector.multi_reduction <add>, %16, %cst_18 [1] : vector<8x256xf32> to vector<8xf32>
    %25 = vector.shape_cast %24 : vector<8xf32> to vector<8x1xf32>
    %26 = arith.addf %23, %25 : vector<8x1xf32>
    %c0_19 = arith.constant 0 : index
    %c0_20 = arith.constant 0 : index
    %27 = vector.load %arg10[%c0_19, %c0_20] : memref<8x1xf32, #tpu.memory_space<vmem>>, vector<8x1xf32>
    tpu.vector_store %arg10[%c0_19, %c0_20], %26 {strides = array<i32>} : memref<8x1xf32, #tpu.memory_space<vmem>>, vector<8x1xf32>,
    %c0_21 = arith.constant 0 : index
    %c0_22 = arith.constant 0 : index
    %28 = vector.load %arg4[%c0_21, %c0_22] : memref<8x256xf32, #tpu.memory_space<vmem>>, vector<8x256xf32>
    %cst_23 = arith.constant 5.000000e-01 : f32
    %29 = vector.broadcast %cst_23 : f32 to vector<8x256xf32>
    %30 = arith.mulf %29, %28 : vector<8x256xf32>
    %31 = math.tanh %30 : vector<8x256xf32>
    %cst_24 = arith.constant 5.000000e-01 : f32
    %32 = vector.broadcast %cst_24 : f32 to vector<8x256xf32>
    %33 = arith.mulf %32, %31 : vector<8x256xf32>
    %cst_25 = arith.constant 5.000000e-01 : f32
    %34 = vector.broadcast %cst_25 : f32 to vector<8x256xf32>
    %35 = arith.addf %33, %34 : vector<8x256xf32>
    %c0_26 = arith.constant 0 : index
    %c0_27 = arith.constant 0 : index
    %36 = vector.load %arg8[%c0_26, %c0_27] : memref<8x1xf32, #tpu.memory_space<vmem>>, vector<8x1xf32>
    %37 = arith.mulf %3, %35 : vector<8x256xf32>
    %cst_28 = arith.constant dense<0.000000e+00> : vector<8xf32>
    %38 = vector.multi_reduction <add>, %37, %cst_28 [1] : vector<8x256xf32> to vector<8xf32>
    %39 = vector.shape_cast %38 : vector<8xf32> to vector<8x1xf32>
    %40 = arith.addf %36, %39 : vector<8x1xf32>
    %c0_29 = arith.constant 0 : index
    %c0_30 = arith.constant 0 : index
    %41 = vector.load %arg8[%c0_29, %c0_30] : memref<8x1xf32, #tpu.memory_space<vmem>>, vector<8x1xf32>
    tpu.vector_store %arg8[%c0_29, %c0_30], %40 {strides = array<i32>} : memref<8x1xf32, #tpu.memory_space<vmem>>, vector<8x1xf32>,
    %c0_31 = arith.constant 0 : index
    %c0_32 = arith.constant 0 : index
    %42 = vector.load %arg11[%c0_31, %c0_32] : memref<8x1xf32, #tpu.memory_space<vmem>>, vector<8x1xf32>
    %cst_33 = arith.constant dense<0.000000e+00> : vector<8xf32>
    %43 = vector.multi_reduction <add>, %35, %cst_33 [1] : vector<8x256xf32> to vector<8xf32>
    %44 = vector.shape_cast %43 : vector<8xf32> to vector<8x1xf32>
    %45 = arith.addf %42, %44 : vector<8x1xf32>
    %c0_34 = arith.constant 0 : index
    %c0_35 = arith.constant 0 : index
    %46 = vector.load %arg11[%c0_34, %c0_35] : memref<8x1xf32, #tpu.memory_space<vmem>>, vector<8x1xf32>
    tpu.vector_store %arg11[%c0_34, %c0_35], %45 {strides = array<i32>} : memref<8x1xf32, #tpu.memory_space<vmem>>, vector<8x1xf32>,
    %c0_36 = arith.constant 0 : index
    %c0_37 = arith.constant 0 : index
    %47 = vector.load %arg5[%c0_36, %c0_37] : memref<8x256xf32, #tpu.memory_space<vmem>>, vector<8x256xf32>
    %cst_38 = arith.constant 5.000000e-01 : f32
    %48 = vector.broadcast %cst_38 : f32 to vector<8x256xf32>
    %49 = arith.mulf %48, %47 : vector<8x256xf32>
    %50 = math.tanh %49 : vector<8x256xf32>
    %cst_39 = arith.constant 5.000000e-01 : f32
    %51 = vector.broadcast %cst_39 : f32 to vector<8x256xf32>
    %52 = arith.mulf %51, %50 : vector<8x256xf32>
    %cst_40 = arith.constant 5.000000e-01 : f32
    %53 = vector.broadcast %cst_40 : f32 to vector<8x256xf32>
    %54 = arith.addf %52, %53 : vector<8x256xf32>
    %c0_41 = arith.constant 0 : index
    %c0_42 = arith.constant 0 : index
    %55 = vector.load %arg9[%c0_41, %c0_42] : memref<8x1xf32, #tpu.memory_space<vmem>>, vector<8x1xf32>
    %56 = arith.mulf %3, %54 : vector<8x256xf32>
    %cst_43 = arith.constant dense<0.000000e+00> : vector<8xf32>
    %57 = vector.multi_reduction <add>, %56, %cst_43 [1] : vector<8x256xf32> to vector<8xf32>
    %58 = vector.shape_cast %57 : vector<8xf32> to vector<8x1xf32>
    %59 = arith.addf %55, %58 : vector<8x1xf32>
    %c0_44 = arith.constant 0 : index
    %c0_45 = arith.constant 0 : index
    %60 = vector.load %arg9[%c0_44, %c0_45] : memref<8x1xf32, #tpu.memory_space<vmem>>, vector<8x1xf32>
    tpu.vector_store %arg9[%c0_44, %c0_45], %59 {strides = array<i32>} : memref<8x1xf32, #tpu.memory_space<vmem>>, vector<8x1xf32>,
    %c0_46 = arith.constant 0 : index
    %c0_47 = arith.constant 0 : index
    %61 = vector.load %arg12[%c0_46, %c0_47] : memref<8x1xf32, #tpu.memory_space<vmem>>, vector<8x1xf32>
    %cst_48 = arith.constant dense<0.000000e+00> : vector<8xf32>
    %62 = vector.multi_reduction <add>, %54, %cst_48 [1] : vector<8x256xf32> to vector<8xf32>
    %63 = vector.shape_cast %62 : vector<8xf32> to vector<8x1xf32>
    %64 = arith.addf %61, %63 : vector<8x1xf32>
    %c0_49 = arith.constant 0 : index
    %c0_50 = arith.constant 0 : index
    %65 = vector.load %arg12[%c0_49, %c0_50] : memref<8x1xf32, #tpu.memory_space<vmem>>, vector<8x1xf32>
    tpu.vector_store %arg12[%c0_49, %c0_50], %64 {strides = array<i32>} : memref<8x1xf32, #tpu.memory_space<vmem>>, vector<8x1xf32>,
    return
  }
  func.func @transform_0(%arg0: i32, %arg1: i32) -> (i32, i32) {
    %c0_i32 = arith.constant 0 : i32
    return %arg0, %arg1 : i32, i32
  }
  func.func @transform_1(%arg0: i32, %arg1: i32) -> (i32, i32) {
    %c0_i32 = arith.constant 0 : i32
    return %arg0, %arg1 : i32, i32
  }
  func.func @transform_2(%arg0: i32, %arg1: i32) -> (i32, i32) {
    %c0_i32 = arith.constant 0 : i32
    return %arg0, %arg1 : i32, i32
  }
  func.func @transform_3(%arg0: i32, %arg1: i32) -> (i32, i32) {
    %c0_i32 = arith.constant 0 : i32
    return %arg0, %arg1 : i32, i32
  }
  func.func @transform_4(%arg0: i32, %arg1: i32) -> (i32, i32) {
    %c0_i32 = arith.constant 0 : i32
    %c0_i32_0 = arith.constant 0 : i32
    return %arg0, %c0_i32 : i32, i32
  }
  func.func @transform_5(%arg0: i32, %arg1: i32) -> (i32, i32) {
    %c0_i32 = arith.constant 0 : i32
    %c0_i32_0 = arith.constant 0 : i32
    return %arg0, %c0_i32 : i32, i32
  }
  func.func @transform_6(%arg0: i32, %arg1: i32) -> (i32, i32) {
    %c0_i32 = arith.constant 0 : i32
    %c0_i32_0 = arith.constant 0 : i32
    return %arg0, %c0_i32 : i32, i32
  }
  func.func @transform_7(%arg0: i32, %arg1: i32) -> (i32, i32) {
    %c0_i32 = arith.constant 0 : i32
    %c0_i32_0 = arith.constant 0 : i32
    return %arg0, %c0_i32 : i32, i32
  }
  func.func @transform_8(%arg0: i32, %arg1: i32) -> (i32, i32) {
    %c0_i32 = arith.constant 0 : i32
    %c0_i32_0 = arith.constant 0 : i32
    return %arg0, %c0_i32 : i32, i32
  }
  func.func @transform_9(%arg0: i32, %arg1: i32) -> (i32, i32) {
    %c0_i32 = arith.constant 0 : i32
    %c0_i32_0 = arith.constant 0 : i32
    return %arg0, %c0_i32 : i32, i32
  }
  func.func @transform_10(%arg0: i32, %arg1: i32) -> (i32, i32) {
    %c0_i32 = arith.constant 0 : i32
    %c0_i32_0 = arith.constant 0 : i32
    return %arg0, %c0_i32 : i32, i32
  }
}

</mosaic_0001>

<bundles_post_ra>
// kernel: tpu_custom_call.1
= control target key start
LH: loop header
LB: loop body
LE: loop exit
PB: predicated region body
PF: predicated region fallthrough
CT: control target
= control target key end

     0   :  { %16 = vsyncpa [#allocation3], 0  ;;  %s491_s0 = inlined_call_operand.hbm [shape: f32[8,256], index: 0, kind: input, shape index: {}]   ;;  %s492_s1 = inlined_call_operand.hbm [shape: f32[8,256], index: 1, kind: input, shape index: {}]   ;;  %s493_s2 = inlined_call_operand.hbm [shape: f32[8,256], index: 2, kind: input, shape index: {}]   ;;  %s494_s3 = inlined_call_operand.hbm [shape: f32[8,256], index: 3, kind: input, shape index: {}]   ;;  %s495_s4 = inlined_call_operand.vmem [shape: f32[8,1], index: 4, kind: output, shape index: {0}]   ;;  %s496_s5 = inlined_call_operand.vmem [shape: f32[8,1], index: 5, kind: output, shape index: {1}]   ;;  %s497_s6 = inlined_call_operand.vmem [shape: f32[8,1], index: 6, kind: output, shape index: {2}]   ;;  %s498_s7 = inlined_call_operand.vmem [shape: f32[8,1], index: 7, kind: output, shape index: {3}]   ;;  %s499_s8 = inlined_call_operand.vmem [shape: f32[8,1], index: 8, kind: output, shape index: {4}]   ;;  %s500_s9 = inlined_call_operand.vmem [shape: f32[8,1], index: 9, kind: output, shape index: {5}]   ;;  %s501_s10 = inlined_call_operand.vmem [shape: f32[8,1], index: 10, kind: output, shape index: {6}]  }
   0x1   :  { %17 = vsyncpa [#allocation5], 0 }
   0x2   :  { %18 = vsyncpa [#allocation8], 0  ;;  %s306_s13 = smov [#allocation4]   ;;  %s307_s15 = smov [#allocation2]  }
   0x3   :  { %s35_s14 = sshll.u32 %s306_s13, 4  ;;  %s25_s16 = sshll.u32 %s307_s15, 4  ;;  %s36_s14 = int_to_ptr.vmem [resolvable:$true] %s35_s14  ;;  %s26_s16 = int_to_ptr.vmem [resolvable:$true] %s25_s16 }
   0x4   :  { %s212_s19 = scalar_lea.hbm %s492_s1, 256 }
   0x5   :  { %p213_p0 = scmp.ne.s32.totalorder %s492_s1, %s212_s19  ;;  %p216_p1 = scmp.lt.u32.totalorder %s212_s19, %s492_s1 }
   0x7   :  { %p218_p2 = pnand %p216_p1, %p213_p0 }
   0x9   :  { %221 = shalt.err (!%p218_p2)
}
   0xa   :  { %s222_s24 = scalar_lea.vmem %s36_s14, 256  ;;  %p227_p4 = scmp.lt.s32.totalorder %s36_s14, %s36_s14 }
   0xb   :  { %p223_p3 = scmp.ne.s32.totalorder %s36_s14, %s222_s24  ;;  %p228_p5 = scmp.lt.s32.totalorder %s222_s24, %s222_s24 }
   0xd   :  { %p229_p6 = por %p228_p5, %p227_p4 }
   0xf   :  { %p230_p7 = pnand %p229_p6, %p223_p3 }
  0x11   :  { %233 = shalt.err (!%p230_p7)
}
  0x12   :  { %38 = dma.hbm_to_vmem [thread:$0]  %s492_s1, 256, %s36_s14, [#allocation5]  }
  0x13   :  { %s234_s29 = scalar_lea.hbm %s491_s0, 256 }
  0x14   :  { %p235_p8 = scmp.ne.s32.totalorder %s491_s0, %s234_s29  ;;  %p238_p9 = scmp.lt.u32.totalorder %s234_s29, %s491_s0 }
  0x16   :  { %p240_p10 = pnand %p238_p9, %p235_p8 }
  0x18   :  { %243 = shalt.err (!%p240_p10)
}
  0x19   :  { %s244_s15 = scalar_lea.vmem %s26_s16, 256  ;;  %p249_p12 = scmp.lt.s32.totalorder %s26_s16, %s26_s16 }
  0x1a   :  { %p245_p11 = scmp.ne.s32.totalorder %s26_s16, %s244_s15  ;;  %p250_p13 = scmp.lt.s32.totalorder %s244_s15, %s244_s15 }
  0x1c   :  { %p251_p0 = por %p250_p13, %p249_p12 }
  0x1e   :  { %p252_p1 = pnand %p251_p0, %p245_p11 }
  0x20   :  { %255 = shalt.err (!%p252_p1)
}
  0x21   :  { %28 = dma.hbm_to_vmem [thread:$0]  %s491_s0, 256, %s26_s16, [#allocation3]  }
  0x22   :  { %s308_s17 = smov [#allocation6]   ;;  %s309_s19 = smov [#allocation7]  }
  0x23   :  { %s45_s18 = sshll.u32 %s308_s17, 4  ;;  %s55_s20 = sshll.u32 %s309_s19, 4  ;;  %s46_s18 = int_to_ptr.vmem [resolvable:$true] %s45_s18  ;;  %s56_s20 = int_to_ptr.vmem [resolvable:$true] %s55_s20 }
  0x24   :  { %s256_s23 = scalar_lea.hbm %s493_s2, 256 }
  0x25   :  { %p257_p2 = scmp.ne.s32.totalorder %s493_s2, %s256_s23  ;;  %p260_p3 = scmp.lt.u32.totalorder %s256_s23, %s493_s2 }
  0x27   :  { %p262_p4 = pnand %p260_p3, %p257_p2 }
  0x29   :  { %265 = shalt.err (!%p262_p4)
}
  0x2a   :  { %s266_s0 = scalar_lea.vmem %s46_s18, 256  ;;  %p271_p6 = scmp.lt.s32.totalorder %s46_s18, %s46_s18 }
  0x2b   :  { %p267_p5 = scmp.ne.s32.totalorder %s46_s18, %s266_s0  ;;  %p272_p7 = scmp.lt.s32.totalorder %s266_s0, %s266_s0 }
  0x2d   :  { %p273_p8 = por %p272_p7, %p271_p6 }
  0x2f   :  { %p274_p9 = pnand %p273_p8, %p267_p5 }
  0x31   :  { %277 = shalt.err (!%p274_p9)
}
  0x32   :  { %48 = dma.hbm_to_vmem [thread:$0]  %s493_s2, 256, %s46_s18, [#allocation5]  }
  0x33   :  { %s278_s11 = scalar_lea.hbm %s494_s3, 256 }
  0x34   :  { %p279_p10 = scmp.ne.s32.totalorder %s494_s3, %s278_s11  ;;  %p282_p11 = scmp.lt.u32.totalorder %s278_s11, %s494_s3 }
  0x36   :  { %p284_p12 = pnand %p282_p11, %p279_p10 }
  0x38   :  { %287 = shalt.err (!%p284_p12)
}
  0x39   :  { %s288_s14 = scalar_lea.vmem %s56_s20, 256  ;;  %p293_p0 = scmp.lt.s32.totalorder %s56_s20, %s56_s20 }
  0x3a   :  { %p289_p13 = scmp.ne.s32.totalorder %s56_s20, %s288_s14  ;;  %p294_p1 = scmp.lt.s32.totalorder %s288_s14, %s288_s14 }
  0x3c   :  { %p295_p2 = por %p294_p1, %p293_p0 }
  0x3e   :  { %p296_p3 = pnand %p295_p2, %p289_p13 }
  0x40   :  { %299 = shalt.err (!%p296_p3)
}
  0x41   :  { %58 = dma.hbm_to_vmem [thread:$0]  %s494_s3, 256, %s56_s20, [#allocation8]  }
  0x42   :  { %300 = dma.done.wait [#allocation3], 256  }
  0x43   :  { %301 = vsyncadd [#allocation3], 4294967040 }
  0x44   :  { %302 = dma.done.wait [#allocation5], 512  }
  0x45   :  { %303 = vsyncadd [#allocation5], 4294966784 }
  0x46   :  { %304 = dma.done.wait [#allocation8], 256  }
  0x47   :  { %305 = vsyncadd [#allocation8], 4294967040  ;;  %vm75_vm0 = vcmask 7168   ;;  %v310_v0 = vmov 0.0   ;;  %v83_v1 = vld [vmem:[#allocation2] sm:$0xff]  ;;  %v84_v2 = vld [vmem:[#allocation2 + $0x8] sm:$0xff] }
  0x48   :  { %76 = vst.msk [vmem:[%s495_s4] sm:$0xff] %vm75_vm0, %v310_v0  ;;  %77 = vst.msk [vmem:[%s496_s5] sm:$0xff] %vm75_vm0, %v310_v0  ;;  %v92_v3 = vld [vmem:[#allocation4] sm:$0xff]  ;;  %v86_v4 = vadd.f32 %v84_v2, %v83_v1  ;;  %v93_v5 = vld [vmem:[#allocation4 + $0x8] sm:$0xff] }
  0x49   :  { %78 = vst.msk [vmem:[%s497_s6] sm:$0xff] %vm75_vm0, %v310_v0  ;;  %79 = vst.msk [vmem:[%s498_s7] sm:$0xff] %vm75_vm0, %v310_v0  ;;  %v94_v6 = vmul.f32 0.5, %v92_v3  ;;  %v116_v7 = vld [vmem:[#allocation6] sm:$0xff]  ;;  %v117_v8 = vld [vmem:[#allocation6 + $0x8] sm:$0xff]  ;;  %v95_v9 = vmul.f32 0.5, %v93_v5 }
  0x4a   :  { %80 = vst.msk [vmem:[%s499_s8] sm:$0xff] %vm75_vm0, %v310_v0  ;;  %81 = vst.msk [vmem:[%s500_s9] sm:$0xff] %vm75_vm0, %v310_v0  ;;  %v118_v10 = vmul.f32 0.5, %v116_v7  ;;  %v119_v11 = vmul.f32 0.5, %v117_v8  ;;  %v140_v12 = vld [vmem:[#allocation7] sm:$0xff]  ;;  %v141_v13 = vld [vmem:[#allocation7 + $0x8] sm:$0xff]  ;;  %87 = vadd.xlane.f32.xlu0 %v86_v4 }
  0x4b   :  { %82 = vst.msk [vmem:[%s501_s10] sm:$0xff] %vm75_vm0, %v310_v0  ;;  %200 = vtanh.f32 %v94_v6  ;;  %v142_v14 = vmul.f32 0.5, %v140_v12  ;;  %v143_v15 = vmul.f32 0.5, %v141_v13 }
  0x4c   :  { %202 = vtanh.f32 %v95_v9 }
  0x4d   :  { %204 = vtanh.f32 %v118_v10 }
  0x4e   :  { %206 = vtanh.f32 %v119_v11 }
  0x4f   :  { %208 = vtanh.f32 %v142_v14  ;;  %v85_v46 = vld [vmem:[%s495_s4] sm:$0xff] }
  0x50   :  { %210 = vtanh.f32 %v143_v15  ;;  %v126_v54 = vld [vmem:[%s497_s6] sm:$0xff] }
  0x51   :  { %v110_v49 = vld [vmem:[%s499_s8] sm:$0xff] }
  0x52   :  { %v134_v51 = vld [vmem:[%s500_s9] sm:$0xff] }
  0x53   :  { %v102_v57 = vld [vmem:[%s496_s5] sm:$0xff] }
  0x54   :  { %v150_v60 = vld [vmem:[%s498_s7] sm:$0xff] }
  0x55   :  { %v201_v16 = vpop.eup %200  ;;  %v158_v63 = vld [vmem:[%s501_s10] sm:$0xff] }
  0x56   :  { %v203_v17 = vpop.eup %202  ;;  %v98_v18 = vmul.f32 0.5, %v201_v16 }
  0x57   :  { %v205_v19 = vpop.eup %204  ;;  %v99_v20 = vmul.f32 0.5, %v203_v17 }
  0x58   :  { %v207_v21 = vpop.eup %206  ;;  %v100_v22 = vadd.f32 0.5, %v98_v18  ;;  %v122_v23 = vmul.f32 0.5, %v205_v19 }
  0x59   :  { %v209_v24 = vpop.eup %208  ;;  %v101_v25 = vadd.f32 0.5, %v99_v20  ;;  %v123_v26 = vmul.f32 0.5, %v207_v21 }
  0x5a   :  { %v211_v27 = vpop.eup %210  ;;  %v124_v28 = vadd.f32 0.5, %v122_v23  ;;  %v103_v29 = vmul.f32 %v100_v22, %v83_v1  ;;  %v146_v30 = vmul.f32 0.5, %v209_v24 }
  0x5b   :  { %v111_v31 = vadd.f32 %v101_v25, %v100_v22  ;;  %v125_v32 = vadd.f32 0.5, %v123_v26  ;;  %v104_v33 = vmul.f32 %v101_v25, %v84_v2  ;;  %v147_v34 = vmul.f32 0.5, %v211_v27 }
  0x5c   :  { %v127_v35 = vmul.f32 %v124_v28, %v83_v1  ;;  %v148_v36 = vadd.f32 0.5, %v146_v30 }
  0x5d   :  { %112 = vadd.xlane.f32.xlu1 %v111_v31  ;;  %v135_v37 = vadd.f32 %v125_v32, %v124_v28  ;;  %v128_v38 = vmul.f32 %v125_v32, %v84_v2  ;;  %v149_v39 = vadd.f32 0.5, %v147_v34  ;;  %v105_v42 = vadd.f32 %v104_v33, %v103_v29 }
  0x5e   :  { %v151_v40 = vmul.f32 %v148_v36, %v83_v1 }
  0x5f   :  { %136 = vadd.xlane.f32.xlu0 %v135_v37  ;;  %v129_v41 = vadd.f32 %v128_v38, %v127_v35  ;;  %v152_v43 = vmul.f32 %v149_v39, %v84_v2  ;;  %v159_v45 = vadd.f32 %v149_v39, %v148_v36 }
  0x61   :  { %130 = vadd.xlane.f32.xlu1 %v129_v41  ;;  %v153_v44 = vadd.f32 %v152_v43, %v151_v40 }
  0x63   :  { %106 = vadd.xlane.f32.xlu0 %v105_v42 }
  0x65   :  { %154 = vadd.xlane.f32.xlu1 %v153_v44 }
  0x67   :  { %160 = vadd.xlane.f32.xlu0 %v159_v45 }
  0xd7   :  { %v88_v47 = vpop.xlane.xlu0 %87 }
  0xd8   :  { %v89_v48 = vadd.f32 %v88_v47, %v85_v46 }
  0xda   :  { %91 = vst.msk [vmem:[%s495_s4] sm:$0xff] %vm75_vm0, %v89_v48 }
  0xea   :  { %v113_v50 = vpop.xlane.xlu1 %112 }
  0xeb   :  { %v114_v52 = vadd.f32 %v113_v50, %v110_v49 }
  0xec   :  { %v137_v53 = vpop.xlane.xlu0 %136 }
  0xed   :  { %115 = vst.msk [vmem:[%s499_s8] sm:$0xff] %vm75_vm0, %v114_v52  ;;  %v138_v55 = vadd.f32 %v137_v53, %v134_v51 }
  0xee   :  { %v131_v56 = vpop.xlane.xlu1 %130 }
  0xef   :  { %139 = vst.msk [vmem:[%s500_s9] sm:$0xff] %vm75_vm0, %v138_v55  ;;  %v132_v58 = vadd.f32 %v131_v56, %v126_v54 }
  0xf0   :  { %v107_v59 = vpop.xlane.xlu0 %106 }
  0xf1   :  { %133 = vst.msk [vmem:[%s497_s6] sm:$0xff] %vm75_vm0, %v132_v58  ;;  %v108_v61 = vadd.f32 %v107_v59, %v102_v57 }
  0xf2   :  { %v155_v62 = vpop.xlane.xlu1 %154 }
  0xf3   :  { %109 = vst.msk [vmem:[%s496_s5] sm:$0xff] %vm75_vm0, %v108_v61  ;;  %v156_v0 = vadd.f32 %v155_v62, %v150_v60 }
  0xf4   :  { %v161_v1 = vpop.xlane.xlu0 %160 }
  0xf5   :  { %157 = vst.msk [vmem:[%s498_s7] sm:$0xff] %vm75_vm0, %v156_v0  ;;  %v162_v2 = vadd.f32 %v161_v1, %v158_v63 }
  0xf7   :  { %163 = vst.msk [vmem:[%s501_s10] sm:$0xff] %vm75_vm0, %v162_v2 }
  0xf8   :  { %192 = vsyncpa [#allocation3], 1 }
  0xf9   :  { %193 = vsyncpa [#allocation5], 1 }
  0xfa   :  { %194 = vsyncpa [#allocation8], 1 }

</bundles_post_ra>
